<compile_context>
chip_gen: v7x
topology: tpu7x:2x2x1
jax: 0.10.0
libtpu: 0.0.40
codegen_flags: <defaults>
</compile_context>

<pallas_src>
import jax
import jax.numpy as jnp
from jax.experimental import pallas as pl
from jax.experimental.pallas import tpu as pltpu


def _san_kernel(x1_ref, x2_ref, w1t_ref, w2t_ref, b12_ref, wat_ref, ba_ref, out_ref):
    bblk, tp, feat = x1_ref.shape
    m_rows = bblk * tp

    # Fused modality projections (K-split over the two modalities) + tanh.
    # bf16 operands, f32 accumulation; reshapes are free views (tp % 16 == 0).
    m = jnp.dot(x1_ref[...].reshape(m_rows, feat), w1t_ref[...],
                preferred_element_type=jnp.float32)
    m = m + jnp.dot(x2_ref[...].reshape(m_rows, feat), w2t_ref[...],
                    preferred_element_type=jnp.float32)
    h = jnp.tanh(m + b12_ref[...])                                  # [M, A] f32

    # Attention logits over time_step_dim; padded key columns carry a -1e30 bias
    # so they vanish under the softmax.
    q = jnp.dot(h.astype(wat_ref.dtype), wat_ref[...],
                preferred_element_type=jnp.float32) + ba_ref[...]   # [M, Tp] f32
    q = q - jnp.max(q, axis=-1, keepdims=True)
    e = jnp.exp(q)
    inv = pl.reciprocal(jnp.sum(e, axis=-1, keepdims=True))         # exact (EUP)
    sm = (e * inv).reshape(bblk, tp, tp)                            # [B, t_query, s_key]

    # out1ᵀ[b] = softmax[b] @ x1ᵀ[b]  — x1 is re-read here (short live range);
    # padded keys have weight 0, so the zero-padded x1 rows are ignored.
    out_ref[...] = jnp.einsum(
        "bts,bsf->btf", sm.astype(x1_ref.dtype), x1_ref[...],
        preferred_element_type=jnp.float32).astype(out_ref.dtype)


def _pick_bblk(B, b_block):
    """Largest divisor of B that is <= b_block, preferring >=2 (ideally even)
    grid steps so both v7x TensorCores stay busy."""
    best, best_key = 1, (-1, -1, -1)
    for d in range(1, B + 1):
        if d > b_block or B % d:
            continue
        steps = B // d
        key = (int(steps >= 2), int(steps % 2 == 0), d)
        if key > best_key:
            best, best_key = d, key
    return best


def _vmem_bytes(bblk, tp, feat, att):
    act = 2                                             # bf16 activation stream
    ins = 2 * 2 * bblk * tp * feat * act                # v1ᵀ + v2ᵀ blocks, double-buffered
    outs = 2 * bblk * tp * feat * 4                     # f32 output block, double-buffered
    wgts = (2 * feat * att + att * tp) * act + (att + tp) * 4
    tmps = bblk * tp * (att + 3 * tp) * 4               # h / logits / softmax intermediates
    return ins + outs + wgts + tmps


def san_attend_time_major(v1t, v2t, params, *, b_block=32):
    """Hot path: time-major activations [B, T, F] in, re-weighted modality-1
    representation [B, T, F] (f32, time-major, lane axis = F) out.  Callers that
    can consume time-major output (and keep v2 separately) should use this
    directly and skip the transpose/concat round-trip in san_forward."""
    B, T, F = v1t.shape
    A = params["w1"].shape[0]
    assert params["wa"].shape[0] == T, "time_step_dim must equal T (same constraint as torch)"

    # Pad T to a multiple of 16 so the bf16 reshapes inside the kernel are free.
    Tp = -(-T // 16) * 16
    pad_t = Tp - T

    x1 = v1t.astype(jnp.bfloat16)
    x2 = v2t.astype(jnp.bfloat16)
    if pad_t:
        x1 = jnp.pad(x1, ((0, 0), (0, pad_t), (0, 0)))
        x2 = jnp.pad(x2, ((0, 0), (0, pad_t), (0, 0)))

    w1t = params["w1"].T.astype(jnp.bfloat16)            # [F, A]
    w2t = params["w2"].T.astype(jnp.bfloat16)            # [F, A]
    b12 = (params["b1"] + params["b2"]).reshape(1, A).astype(jnp.float32)
    wat = params["wa"].T.astype(jnp.bfloat16)            # [A, T]
    ba = params["ba"].reshape(1, T).astype(jnp.float32)
    if pad_t:
        wat = jnp.pad(wat, ((0, 0), (0, pad_t)))
        ba = jnp.pad(ba, ((0, 0), (0, pad_t)), constant_values=-1e30)  # mask pad keys

    # Batch blocking: largest divisor of B <= b_block that keeps >=2 grid steps.
    # NOTE: awkward/prime B degrades toward bblk=1 (correct, just less efficient).
    budget = 40 * 2**20                                  # headroom under v7x's 64 MiB VMEM
    bblk = _pick_bblk(B, b_block)
    while bblk > 1 and _vmem_bytes(bblk, Tp, F, A) > budget:
        bblk = _pick_bblk(B, bblk // 2)
    vmem_limit = int(min(48 * 2**20, max(32 * 2**20, 2 * _vmem_bytes(bblk, Tp, F, A))))

    def resident(shape):
        # Constant block index ⇒ weights stay VMEM-resident, no per-step refetch.
        return pl.BlockSpec(shape, lambda i: (0,) * len(shape))

    out1t_p = pl.pallas_call(
        _san_kernel,
        out_shape=jax.ShapeDtypeStruct((B, Tp, F), jnp.float32),
        grid=(B // bblk,),
        in_specs=[
            pl.BlockSpec((bblk, Tp, F), lambda i: (i, 0, 0)),   # x1ᵀ block (bf16)
            pl.BlockSpec((bblk, Tp, F), lambda i: (i, 0, 0)),   # x2ᵀ block (bf16)
            resident((F, A)),                                   # W1ᵀ
            resident((F, A)),                                   # W2ᵀ
            resident((1, A)),                                   # b1 + b2
            resident((A, Tp)),                                  # Waᵀ (zero-padded)
            resident((1, Tp)),                                  # ba (+ -1e30 pad mask)
        ],
        out_specs=pl.BlockSpec((bblk, Tp, F), lambda i: (i, 0, 0)),  # lane axis = F
        compiler_params=pltpu.CompilerParams(
            dimension_semantics=("parallel",),
            vmem_limit_bytes=vmem_limit,
            # Let XLA fuse the wrapper-side transpose/cast/pad into the two
            # activation operands instead of materializing them in HBM.
            allow_input_fusion=[True, True, False, False, False, False, False],
        ),
    )(x1, x2, w1t, w2t, b12, wat, ba)

    return out1t_p[:, :T, :] if pad_t else out1t_p


def san_forward(v1, v2, params, *, b_block=32):
    """Module-compatible wrapper: v1, v2 are [B, F, T]; returns [B, 2F, T] like
    the PyTorch forward.  The surrounding transpose/concat is pure XLA data
    movement; bandwidth-sensitive callers should use san_attend_time_major."""
    out1t = san_attend_time_major(jnp.swapaxes(v1, 1, 2), jnp.swapaxes(v2, 1, 2),
                                  params, b_block=b_block)
    out1 = jnp.swapaxes(out1t, 1, 2)                     # [B, F, T]
    return jnp.concatenate([out1, v2], axis=1)           # [B, 2F, T]


def init_params(key, F, A, T):
    """Deterministic synthetic init: Xavier-uniform weights, torch-default-style biases."""
    k1, k2, k3, k4, k5, k6 = jax.random.split(key, 6)

    def xavier(k, shape):  # shape = (out, in), like torch Linear.weight
        fan_out, fan_in = shape
        limit = (6.0 / (fan_in + fan_out)) ** 0.5
        return jax.random.uniform(k, shape, jnp.float32, -limit, limit)

    def bias(k, fan_in, n):
        bound = 1.0 / (fan_in ** 0.5)
        return jax.random.uniform(k, (n,), jnp.float32, -bound, bound)

    return dict(
        w1=xavier(k1, (A, F)), b1=bias(k2, F, A),
        w2=xavier(k3, (A, F)), b2=bias(k4, F, A),
        wa=xavier(k5, (T, A)), ba=bias(k6, A, T),
    )


def san_ref(v1, v2, p):
    """Pure-JAX f32 reference mirroring the PyTorch forward."""
    x1t = jnp.swapaxes(v1, 1, 2)
    x2t = jnp.swapaxes(v2, 1, 2)
    m1 = x1t @ p["w1"].T + p["b1"]
    m2 = x2t @ p["w2"].T + p["b2"]
    h = jnp.tanh(m1 + m2)
    p_att = h @ p["wa"].T + p["ba"]
    sm = jax.nn.softmax(p_att, axis=-1)
    p_I = jnp.swapaxes(sm, 1, 2)
    out1 = jnp.matmul(v1, p_I)
    return jnp.concatenate([out1, v2], axis=1)


if __name__ == "__main__":
    # Small shapes consistent with the module (original: F=512, A=256, T=12).
    # T=12 deliberately exercises the pad-to-16 + key-mask path; B=8 gives a
    # 2-step parallel grid with the default block picker.
    B, F, A, T = 8, 128, 64, 12

    key = jax.random.PRNGKey(0)
    kp, k1, k2 = jax.random.split(key, 3)
    params = init_params(kp, F, A, T)
    v1 = jax.random.normal(k1, (B, F, T), jnp.float32)
    v2 = jax.random.normal(k2, (B, F, T), jnp.float32)

    fwd = jax.jit(san_forward)
    out = jax.block_until_ready(fwd(v1, v2, params))

    ref = san_ref(v1, v2, params)
    assert out.shape == (B, 2 * F, T)
    # Tolerance accounts for bf16 activation/weight streaming inside the kernel.
    assert jnp.allclose(out, ref, atol=5e-2, rtol=5e-2), (
        "mismatch vs reference; max abs err = %f" % float(jnp.max(jnp.abs(out - ref))))

    print("KERNEL_OK")
</pallas_src>

<mosaic_0001>
module attributes {stable_mosaic.version = 11 : i64} {
  func.func @_san_kernel(%arg0: i32, %arg1: memref<4x16x128xbf16, #tpu.memory_space<vmem>>, %arg2: memref<4x16x128xbf16, #tpu.memory_space<vmem>>, %arg3: memref<128x64xbf16, #tpu.memory_space<vmem>>, %arg4: memref<128x64xbf16, #tpu.memory_space<vmem>>, %arg5: memref<1x64xf32, #tpu.memory_space<vmem>>, %arg6: memref<64x16xbf16, #tpu.memory_space<vmem>>, %arg7: memref<1x16xf32, #tpu.memory_space<vmem>>, %arg8: memref<4x16x128xf32, #tpu.memory_space<vmem>>) attributes {dimension_semantics = [#tpu.dimension_semantics<parallel>], iteration_bounds = array<i64: 2>, scalar_prefetch = 0 : i64, scratch_operands = 0 : i64, tpu.core_type = #tpu.core_type<tc>, window_params = [{transform_indices = @transform_0, window_bounds = array<i64: 4, 16, 128>}, {transform_indices = @transform_1, window_bounds = array<i64: 4, 16, 128>}, {pipeline_mode = #tpu.pipeline_mode<synchronous>, transform_indices = @transform_2, window_bounds = array<i64: 128, 64>}, {pipeline_mode = #tpu.pipeline_mode<synchronous>, transform_indices = @transform_3, window_bounds = array<i64: 128, 64>}, {pipeline_mode = #tpu.pipeline_mode<synchronous>, transform_indices = @transform_4, window_bounds = array<i64: 1, 64>}, {pipeline_mode = #tpu.pipeline_mode<synchronous>, transform_indices = @transform_5, window_bounds = array<i64: 64, 16>}, {pipeline_mode = #tpu.pipeline_mode<synchronous>, transform_indices = @transform_6, window_bounds = array<i64: 1, 16>}, {transform_indices = @transform_7, window_bounds = array<i64: 4, 16, 128>}]} {
    %c0 = arith.constant 0 : index
    %c0_0 = arith.constant 0 : index
    %c0_1 = arith.constant 0 : index
    %0 = vector.load %arg1[%c0, %c0_0, %c0_1] : memref<4x16x128xbf16, #tpu.memory_space<vmem>>, vector<4x16x128xbf16>
    %1 = vector.shape_cast %0 : vector<4x16x128xbf16> to vector<64x128xbf16>
    %c0_2 = arith.constant 0 : index
    %c0_3 = arith.constant 0 : index
    %2 = vector.load %arg3[%c0_2, %c0_3] : memref<128x64xbf16, #tpu.memory_space<vmem>>, vector<128x64xbf16>
    %cst = arith.constant dense<0.000000e+00> : vector<64x64xf32>
    %3 = tpu.matmul %1, %2, %cst {dimension_numbers = #tpu.dot_dimension_numbers<[1], [0], [0], [1], [0, 0, 1, 1], [], []>} : vector<64x128xbf16>, vector<128x64xbf16>, vector<64x64xf32> -> vector<64x64xf32>
    %c0_4 = arith.constant 0 : index
    %c0_5 = arith.constant 0 : index
    %c0_6 = arith.constant 0 : index
    %4 = vector.load %arg2[%c0_4, %c0_5, %c0_6] : memref<4x16x128xbf16, #tpu.memory_space<vmem>>, vector<4x16x128xbf16>
    %5 = vector.shape_cast %4 : vector<4x16x128xbf16> to vector<64x128xbf16>
    %c0_7 = arith.constant 0 : index
    %c0_8 = arith.constant 0 : index
    %6 = vector.load %arg4[%c0_7, %c0_8] : memref<128x64xbf16, #tpu.memory_space<vmem>>, vector<128x64xbf16>
    %cst_9 = arith.constant dense<0.000000e+00> : vector<64x64xf32>
    %7 = tpu.matmul %5, %6, %cst_9 {dimension_numbers = #tpu.dot_dimension_numbers<[1], [0], [0], [1], [0, 0, 1, 1], [], []>} : vector<64x128xbf16>, vector<128x64xbf16>, vector<64x64xf32> -> vector<64x64xf32>
    %8 = arith.addf %3, %7 : vector<64x64xf32>
    %c0_10 = arith.constant 0 : index
    %c0_11 = arith.constant 0 : index
    %9 = vector.load %arg5[%c0_10, %c0_11] : memref<1x64xf32, #tpu.memory_space<vmem>>, vector<1x64xf32>
    %10 = vector.broadcast %9 : vector<1x64xf32> to vector<64x64xf32>
    %11 = arith.addf %8, %10 : vector<64x64xf32>
    %12 = math.tanh %11 : vector<64x64xf32>
    %13 = arith.truncf %12 : vector<64x64xf32> to vector<64x64xbf16>
    %c0_12 = arith.constant 0 : index
    %c0_13 = arith.constant 0 : index
    %14 = vector.load %arg6[%c0_12, %c0_13] : memref<64x16xbf16, #tpu.memory_space<vmem>>, vector<64x16xbf16>
    %cst_14 = arith.constant dense<0.000000e+00> : vector<64x16xf32>
    %15 = tpu.matmul %13, %14, %cst_14 {dimension_numbers = #tpu.dot_dimension_numbers<[1], [0], [0], [1], [0, 0, 1, 1], [], []>} : vector<64x64xbf16>, vector<64x16xbf16>, vector<64x16xf32> -> vector<64x16xf32>
    %c0_15 = arith.constant 0 : index
    %c0_16 = arith.constant 0 : index
    %16 = vector.load %arg7[%c0_15, %c0_16] : memref<1x16xf32, #tpu.memory_space<vmem>>, vector<1x16xf32>
    %17 = vector.broadcast %16 : vector<1x16xf32> to vector<64x16xf32>
    %18 = arith.addf %15, %17 : vector<64x16xf32>
    %cst_17 = arith.constant dense<0xFF800000> : vector<64xf32>
    %19 = vector.multi_reduction <maximumf>, %18, %cst_17 [1] : vector<64x16xf32> to vector<64xf32>
    %20 = vector.shape_cast %19 : vector<64xf32> to vector<64x1xf32>
    %21 = vector.broadcast %20 : vector<64x1xf32> to vector<64x16xf32>
    %22 = arith.subf %18, %21 : vector<64x16xf32>
    %23 = math.exp %22 : vector<64x16xf32>
    %cst_18 = arith.constant dense<0.000000e+00> : vector<64xf32>
    %24 = vector.multi_reduction <add>, %23, %cst_18 [1] : vector<64x16xf32> to vector<64xf32>
    %25 = vector.shape_cast %24 : vector<64xf32> to vector<64x1xf32>
    %26 = tpu.reciprocal %25 : vector<64x1xf32> -> vector<64x1xf32>
    %27 = vector.broadcast %26 : vector<64x1xf32> to vector<64x16xf32>
    %28 = arith.mulf %23, %27 : vector<64x16xf32>
    %29 = vector.shape_cast %28 : vector<64x16xf32> to vector<4x16x16xf32>
    %30 = arith.truncf %29 : vector<4x16x16xf32> to vector<4x16x16xbf16>
    %c0_19 = arith.constant 0 : index
    %c0_20 = arith.constant 0 : index
    %c0_21 = arith.constant 0 : index
    %31 = vector.load %arg1[%c0_19, %c0_20, %c0_21] : memref<4x16x128xbf16, #tpu.memory_space<vmem>>, vector<4x16x128xbf16>
    "tpu.trace_start"() <{level = 10 : i32, message = "bts,bsf->btf"}> : () -> ()
    %cst_22 = arith.constant dense<0.000000e+00> : vector<4x16x128xf32>
    %32 = tpu.matmul %30, %31, %cst_22 {dimension_numbers = #tpu.dot_dimension_numbers<[2], [1], [1], [2], [0, 0, 0, 1, 1, 2], [0], [0]>} : vector<4x16x16xbf16>, vector<4x16x128xbf16>, vector<4x16x128xf32> -> vector<4x16x128xf32>
    "tpu.trace_stop"() : () -> ()
    %c0_23 = arith.constant 0 : index
    %c0_24 = arith.constant 0 : index
    %c0_25 = arith.constant 0 : index
    %33 = vector.load %arg8[%c0_23, %c0_24, %c0_25] : memref<4x16x128xf32, #tpu.memory_space<vmem>>, vector<4x16x128xf32>
    tpu.vector_store %arg8[%c0_23, %c0_24, %c0_25], %32 {strides = array<i32>} : memref<4x16x128xf32, #tpu.memory_space<vmem>>, vector<4x16x128xf32>,
    return
  }
  func.func @transform_0(%arg0: i32) -> (i32, i32, i32) {
    %c0_i32 = arith.constant 0 : i32
    %c0_i32_0 = arith.constant 0 : i32
    %c0_i32_1 = arith.constant 0 : i32
    return %arg0, %c0_i32, %c0_i32_0 : i32, i32, i32
  }
  func.func @transform_1(%arg0: i32) -> (i32, i32, i32) {
    %c0_i32 = arith.constant 0 : i32
    %c0_i32_0 = arith.constant 0 : i32
    %c0_i32_1 = arith.constant 0 : i32
    return %arg0, %c0_i32, %c0_i32_0 : i32, i32, i32
  }
  func.func @transform_2(%arg0: i32) -> (i32, i32) {
    %c0_i32 = arith.constant 0 : i32
    %c0_i32_0 = arith.constant 0 : i32
    %c0_i32_1 = arith.constant 0 : i32
    return %c0_i32, %c0_i32_0 : i32, i32
  }
  func.func @transform_3(%arg0: i32) -> (i32, i32) {
    %c0_i32 = arith.constant 0 : i32
    %c0_i32_0 = arith.constant 0 : i32
    %c0_i32_1 = arith.constant 0 : i32
    return %c0_i32, %c0_i32_0 : i32, i32
  }
  func.func @transform_4(%arg0: i32) -> (i32, i32) {
    %c0_i32 = arith.constant 0 : i32
    %c0_i32_0 = arith.constant 0 : i32
    %c0_i32_1 = arith.constant 0 : i32
    return %c0_i32, %c0_i32_0 : i32, i32
  }
  func.func @transform_5(%arg0: i32) -> (i32, i32) {
    %c0_i32 = arith.constant 0 : i32
    %c0_i32_0 = arith.constant 0 : i32
    %c0_i32_1 = arith.constant 0 : i32
    return %c0_i32, %c0_i32_0 : i32, i32
  }
  func.func @transform_6(%arg0: i32) -> (i32, i32) {
    %c0_i32 = arith.constant 0 : i32
    %c0_i32_0 = arith.constant 0 : i32
    %c0_i32_1 = arith.constant 0 : i32
    return %c0_i32, %c0_i32_0 : i32, i32
  }
  func.func @transform_7(%arg0: i32) -> (i32, i32, i32) {
    %c0_i32 = arith.constant 0 : i32
    %c0_i32_0 = arith.constant 0 : i32
    %c0_i32_1 = arith.constant 0 : i32
    return %arg0, %c0_i32, %c0_i32_0 : i32, i32, i32
  }
}

</mosaic_0001>

<bundles_post_ra>
// kernel: san_forward.2
= control target key start
LH: loop header
LB: loop body
LE: loop exit
PB: predicated region body
PF: predicated region fallthrough
CT: control target
= control target key end

     0   :  { %s1766_s29 = smov 0   ;;  %s1943_s0 = inlined_call_operand.vmem [shape: bf16[128,64], index: 0, kind: input, shape index: {}]   ;;  %s1944_s1 = inlined_call_operand.vmem [shape: bf16[128,64], index: 1, kind: input, shape index: {}]   ;;  %s1945_s2 = inlined_call_operand.vmem [shape: f32[1,64], index: 2, kind: input, shape index: {}]   ;;  %s1946_s3 = inlined_call_operand.vmem [shape: bf16[64,16], index: 3, kind: input, shape index: {}]   ;;  %s1947_s4 = inlined_call_operand.vmem [shape: f32[1,16], index: 4, kind: input, shape index: {}]   ;;  %s1948_s5 = inlined_call_operand.vmem [shape: bf16[8,12,128], index: 5, kind: input, shape index: {}]   ;;  %s1949_s6 = inlined_call_operand.<no memory space> [shape: bf16[], index: 6, kind: input, shape index: {}]   ;;  %s1950_s7 = inlined_call_operand.vmem [shape: bf16[8,12,128], index: 7, kind: input, shape index: {}]   ;;  %s1951_s8 = inlined_call_operand.vmem [shape: f32[8,16,128], index: 8, kind: output, shape index: {}]  }
   0x1   :  { %v13_v0 = vstv %s1949_s6 }
   0x2   :  { %v1764_v1 = vunpack.i.l.bf16 %v13_v0 }
   0x3 LB: > { %s1413_s30 = sadd.s32 4294967295, %s1712_s29   ;;  %p1417_p0 = scmp.ge.s32.totalorder %s1712_s29, 1  ;;  %s1712_s29 = sphi %s1766_s29, %s28_s29  }
   0x4   : > { %p262_p1 = scmp.lt.s32.totalorder %s1712_s29, 3 }
   0x6   : > { %p263_p2 = pnand %p1417_p0, %p262_p1 }
   0x8   : > { %266 = sbr.rel (%p263_p2) target bundleno = 1085 (0x43d), region = 48 }
   0xf   : > { %v1630_v2 = vld [vmem:[%s1944_s1] sm:$0xff]   ;;  %s1418_s6 = sshll.u32 %s1413_s30, 2  ;;  %v347_v3 = vlaneseq  ;;  %v1631_v4 = vld [vmem:[%s1944_s1 + $0x8] sm:$0xff]   ;;  %v1632_v6 = vld [vmem:[%s1944_s1 + $0x10] sm:$0xff]   ;;  %v1714_v17 = vmov 0.0   ;;  %vm988_vm1 = vcmask 523264  }
  0x10   : > { %p303_p3 = scmp.lt.s32.totalorder %s1418_s6, 7  ;;  %1524 = vmatprep.subr.bf16.mxu0 %v1630_v2  ;;  %v1633_v8 = vld [vmem:[%s1944_s1 + $0x18] sm:$0xff]   ;;  %v1634_v16 = vld [vmem:[%s1944_s1 + $0x20] sm:$0xff]   ;;  %v1635_v20 = vld [vmem:[%s1944_s1 + $0x28] sm:$0xff]   ;;  %vm1066_vm2 = vcmask 130048   ;;  %vm1715_vm3 = vmmov 0  }
  0x11   : > { %v348_v5 = vshrl.u32 %v347_v3, 7  ;;  %1525 = vmatpush3.bf16.msra.mxu0 %v1630_v2  ;;  %v1636_v26 = vld [vmem:[%s1944_s1 + $0x30] sm:$0xff]   ;;  %v1637_v42 = vld [vmem:[%s1944_s1 + $0x38] sm:$0xff]   ;;  %v1639_v51 = vld [vmem:[%s1943_s0] sm:$0xff]  }
  0x12   : > { %s1953_s6 = smov (!%p303_p3, %s1418_s6), 7  ;;  %1526 = vmatprep.subr.bf16.mxu0 %v1631_v4  ;;  %v1641_v54 = vld [vmem:[%s1943_s0 + $0x8] sm:$0xff]   ;;  %v1642_v55 = vld [vmem:[%s1943_s0 + $0x10] sm:$0xff]   ;;  %v1643_v58 = vld [vmem:[%s1943_s0 + $0x18] sm:$0xff]  }
  0x13   : > { %v1785_v7 = vadd.s32 8, %v348_v5  ;;  %s1481_s15 = sshll.u32 %s1953_s6, 3  ;;  %v1644_v59 = vld [vmem:[%s1943_s0 + $0x20] sm:$0xff]   ;;  %v1645_v60 = vld [vmem:[%s1943_s0 + $0x28] sm:$0xff]   ;;  %v1648_v61 = vld [vmem:[%s1943_s0 + $0x30] sm:$0xff]  }
  0x14   : > { %s314_s18 = scalar_lea.vmem %s1948_s5, %s1481_s15  ;;  %s307_s27 = scalar_lea.vmem %s1950_s7, %s1481_s15  ;;  %v1649_v62 = vld [vmem:[%s1943_s0 + $0x38] sm:$0xff]   ;;  %v1654_v3 = vld [vmem:[%s1946_s3] sm:$0xff]   ;;  %v1656_v5 = vld [vmem:[%s1946_s3 + $0x10] sm:$0xff]  }
  0x15   : > { %1527 = vmatpush3.bf16.msra.mxu0 %v1631_v4  ;;  %vm350_vm0 = vcmp.lt.s32.totalorder %v1785_v7, 12  ;;  %v461_v9 = vld [vmem:[%s314_s18] sm:$0xf]  ;;  %v1434_v10 = vld [vmem:[%s314_s18 + $0x4] ss:$8 sps:$4 sm:$0xff]   ;;  %1572 = vmatprep.subr.bf16.mxu1 %v1654_v3 }
  0x16   : > { %1528 = vmatprep.subr.bf16.mxu0 %v1632_v6  ;;  %471 = vst [vmem:[#allocation13] sm:$0xf] %v461_v9  ;;  %v483_v11 = vunpack.c.l.bf16 %v1434_v10  ;;  %v1435_v12 = vld [vmem:[%s314_s18 + $0x8] sm:$0xf]  ;;  %v518_v13 = vunpack.c.h.bf16 %v1434_v10  ;;  %v1437_v21 = vld [vmem:[%s314_s18 + $0x10] sm:$0xf]  ;;  %1573 = vmatpush3.bf16.msra.mxu1 %v1654_v3 }
  0x17   : > { %506 = vst [vmem:[#allocation13 + $0x8] sm:$0xf] %v1435_v12  ;;  %v1438_v22 = vld [vmem:[%s314_s18 + $0x14] ss:$8 sps:$4 sm:$0xff]   ;;  %v1439_v23 = vld [vmem:[%s314_s18 + $0x18] sm:$0xf] }
  0x18   : > { %v489_v14 = vsel %vm350_vm0, %v483_v11, %v1764_v1  ;;  %v524_v15 = vsel %vm350_vm0, %v518_v13, %v1764_v1  ;;  %541 = vst [vmem:[#allocation13 + $0x10] sm:$0xf] %v1437_v21  ;;  %v553_v24 = vunpack.c.l.bf16 %v1438_v22  ;;  %576 = vst [vmem:[#allocation13 + $0x18] sm:$0xf] %v1439_v23  ;;  %v588_v25 = vunpack.c.h.bf16 %v1438_v22  ;;  %v323_v29 = vld [vmem:[%s307_s27] sm:$0xf] }
  0x19   : > { %1529 = vmatpush3.bf16.msra.mxu0 %v1632_v6  ;;  %v491_v18 = vpack.c.bf16 %v1714_v17, %v489_v14  ;;  %v526_v19 = vpack.c.bf16 %v1714_v17, %v524_v15  ;;  %333 = vst [vmem:[#allocation12] sm:$0xf] %v323_v29  ;;  %v1427_v32 = vld [vmem:[%s307_s27 + $0x4] ss:$8 sps:$4 sm:$0xff]   ;;  %v1428_v33 = vld [vmem:[%s307_s27 + $0x8] sm:$0xf] }
  0x1a   : > { %1530 = vmatprep.subr.bf16.mxu0 %v1633_v8  ;;  %v559_v27 = vsel %vm350_vm0, %v553_v24, %v1764_v1  ;;  %v594_v28 = vsel %vm350_vm0, %v588_v25, %v1764_v1  ;;  %v1430_v34 = vld [vmem:[%s307_s27 + $0x10] sm:$0xf]  ;;  %v345_v35 = vunpack.c.l.bf16 %v1427_v32  ;;  %368 = vst [vmem:[#allocation12 + $0x8] sm:$0xf] %v1428_v33  ;;  %v380_v36 = vunpack.c.h.bf16 %v1427_v32  ;;  %v1431_v37 = vld [vmem:[%s307_s27 + $0x14] ss:$8 sps:$4 sm:$0xff]  }
  0x1b   : > { %493 = vst [vmem:[#allocation13 + $0x4] sm:$0xf] %v491_v18  ;;  %528 = vst [vmem:[#allocation13 + $0xc] sm:$0xf] %v526_v19  ;;  %v561_v30 = vpack.c.bf16 %v1714_v17, %v559_v27  ;;  %v596_v31 = vpack.c.bf16 %v1714_v17, %v594_v28  ;;  %v1432_v38 = vld [vmem:[%s307_s27 + $0x18] sm:$0xf]  ;;  %v415_v40 = vunpack.c.l.bf16 %v1431_v37  ;;  %v450_v41 = vunpack.c.h.bf16 %v1431_v37 }
  0x1c   : > { %403 = vst [vmem:[#allocation12 + $0x10] sm:$0xf] %v1430_v34  ;;  %438 = vst [vmem:[#allocation12 + $0x18] sm:$0xf] %v1432_v38  ;;  %v351_v43 = vsel %vm350_vm0, %v345_v35, %v1764_v1  ;;  %v386_v44 = vsel %vm350_vm0, %v380_v36, %v1764_v1  ;;  %v1655_v4 = vld [vmem:[%s1946_s3 + $0x8] sm:$0xff]   ;;  %v1657_v6 = vld [vmem:[%s1946_s3 + $0x18] sm:$0xff]  }
  0x1d   : > { %1531 = vmatpush3.bf16.msra.mxu0 %v1633_v8  ;;  %563 = vst [vmem:[#allocation13 + $0x14] sm:$0xf] %v561_v30  ;;  %598 = vst [vmem:[#allocation13 + $0x1c] sm:$0xf] %v596_v31  ;;  %v353_v45 = vpack.c.bf16 %v1714_v17, %v351_v43  ;;  %v388_v46 = vpack.c.bf16 %v1714_v17, %v386_v44  ;;  %v421_v47 = vsel %vm350_vm0, %v415_v40, %v1764_v1  ;;  %v1465_v7 = vld [vmem:[%s1945_s2] ss:$0 sm:$0xff] }
  0x1e   : > { %1532 = vmatprep.subr.bf16.mxu0 %v1634_v16  ;;  %v423_v48 = vpack.c.bf16 %v1714_v17, %v421_v47  ;;  %v456_v49 = vsel %vm350_vm0, %v450_v41, %v1764_v1  ;;  %1574 = vmatprep.subr.bf16.mxu1 %v1655_v4  ;;  %v1466_v37 = vld [vmem:[%s1947_s4] ss:$0 sm:$0xff]  ;;  %s1483_s18 = sshll.u32 %s1953_s6, 4 }
  0x1f   : > { %355 = vst [vmem:[#allocation12 + $0x4] sm:$0xf] %v353_v45  ;;  %390 = vst [vmem:[#allocation12 + $0xc] sm:$0xf] %v388_v46  ;;  %v458_v50 = vpack.c.bf16 %v1714_v17, %v456_v49  ;;  %1575 = vmatpush3.bf16.msra.mxu1 %v1655_v4  ;;  %s321_s21 = scalar_lea.vmem %s1951_s8, %s1483_s18 }
  0x20   : > { %425 = vst [vmem:[#allocation12 + $0x14] sm:$0xf] %v423_v48  ;;  %1576 = vmatprep.subr.bf16.mxu1 %v1656_v5 }
  0x21   : > { %1533 = vmatpush3.bf16.msra.mxu0 %v1634_v16  ;;  %460 = vst [vmem:[#allocation12 + $0x1c] sm:$0xf] %v458_v50 }
  0x22   : > { %1534 = vmatprep.subr.bf16.mxu0 %v1635_v20  ;;  %v1638_v39 = vld [vmem:[#allocation13] sm:$0xff]   ;;  %v1640_v52 = vld [vmem:[#allocation13 + $0x8] sm:$0xff]  }
  0x23   : > { %1540 = vmatprep.mubr.bf16.mxu0 %v1638_v39  ;;  %1577 = vmatpush3.bf16.msra.mxu1 %v1656_v5 }
  0x24   : > { %v1646_v53 = vld [vmem:[#allocation13 + $0x10] sm:$0xff]   ;;  %v1647_v56 = vld [vmem:[#allocation13 + $0x18] sm:$0xff]   ;;  %1578 = vmatprep.subr.bf16.mxu1 %v1657_v6 }
  0x25   : > { %1535 = vmatpush3.bf16.msra.mxu0 %v1635_v20 }
  0x26   : > { %1536 = vmatprep.subr.bf16.mxu0 %v1636_v26  ;;  %v1855_v57 = vld [vmem:[#allocation12] sm:$0xff]   ;;  %v1873_v63 = vld [vmem:[#allocation12 + $0x8] sm:$0xff]  }
  0x27   : > { %v1875_v0 = vld [vmem:[#allocation12 + $0x10] sm:$0xff]   ;;  %1579 = vmatpush3.bf16.msra.mxu1 %v1657_v6 }
  0x28   : > { %v1879_v2 = vld [vmem:[#allocation12 + $0x18] sm:$0xff]   ;;  %1588 = vmatprep.subr.bf16.mxu1 %v1714_v17 }
  0x29   : > { %1537 = vmatpush3.bf16.msra.mxu0 %v1636_v26 }
  0x2a   : > { %1538 = vmatprep.subr.bf16.mxu0 %v1637_v42 }
  0x2d   : > { %1539 = vmatpush3.bf16.msra.mxu0 %v1637_v42 }
  0x2e   : > { %1548 = vmatprep.subr.bf16.mxu0 %v1639_v51 }
  0x30   : > { %1541 = vmatmul.mubr.bf16.vlgmr.msra.gmra.mrb[0].mxu0 %v1640_v52 }
  0x31   : > { %1549 = vmatpush3.bf16.msra.mxu0 %v1639_v51  ;;  %1544 = vmatprep.mubr.bf16.mxu0 %v1646_v53 }
  0x32   : > { %1550 = vmatprep.subr.bf16.mxu0 %v1641_v54 }
  0x35   : > { %1551 = vmatpush3.bf16.msra.mxu0 %v1641_v54 }
  0x36   : > { %1552 = vmatprep.subr.bf16.mxu0 %v1642_v55 }
  0x38   : > { %1545 = vmatmul.mubr.bf16.gmra.mrb[4].mxu0 %v1647_v56 }
  0x39   : > { %1553 = vmatpush3.bf16.msra.mxu0 %v1642_v55  ;;  %1564 = vmatprep.mubr.bf16.mxu0 %v1855_v57 }
  0x3a   : > { %1554 = vmatprep.subr.bf16.mxu0 %v1643_v58 }
  0x3d   : > { %1555 = vmatpush3.bf16.msra.mxu0 %v1643_v58 }
  0x3e   : > { %1556 = vmatprep.subr.bf16.mxu0 %v1644_v59 }
  0x41   : > { %1557 = vmatpush3.bf16.msra.mxu0 %v1644_v59 }
  0x42   : > { %1558 = vmatprep.subr.bf16.mxu0 %v1645_v60 }
  0x45   : > { %1559 = vmatpush3.bf16.msra.mxu0 %v1645_v60 }
  0x46   : > { %1560 = vmatprep.subr.bf16.mxu0 %v1648_v61 }
  0x49   : > { %1561 = vmatpush3.bf16.msra.mxu0 %v1648_v61 }
  0x4a   : > { %1562 = vmatprep.subr.bf16.mxu0 %v1649_v62 }
  0x4d   : > { %1563 = vmatpush3.bf16.msra.mxu0 %v1649_v62 }
  0x50   : > { %1565 = vmatmul.mubr.bf16.vlgmr.msra.gmra.mrb[0].mxu0 %v1873_v63 }
  0x51   : > { %1568 = vmatprep.mubr.bf16.mxu0 %v1875_v0 }
  0x58   : > { %1569 = vmatmul.mubr.bf16.gmra.mrb[4].mxu0 %v1879_v2 }
 0x123   : > { %v1566_v8 = vpop.f32.mrb[0].mxu0 }
 0x124   : > { %v931_v9 = vadd.f32 %v1566_v8, %v1465_v7  ;;  %v891_v10 = vpop.f32.mrb[1].mxu0 }
 0x125   : > { %v929_v11 = vadd.f32 %v1465_v7, %v891_v10  ;;  %v1567_v12 = vpop.f32.mrb[2].mxu0 }
 0x126   : > { %1658 = vtanh.f32 %v931_v9  ;;  %v932_v13 = vadd.f32 %v1567_v12, %v1465_v7  ;;  %v894_v14 = vpop.f32.mrb[3].mxu0 }
 0x127   : > { %1660 = vtanh.f32 %v929_v11  ;;  %v930_v15 = vadd.f32 %v1465_v7, %v894_v14 }
 0x128   : > { %1662 = vtanh.f32 %v932_v13 }
 0x129   : > { %1664 = vtanh.f32 %v930_v15 }
 0x12b   : > { %v1570_v16 = vpop.f32.mrb[4].mxu0 }
 0x12c   : > { %v935_v18 = vadd.f32 %v1570_v16, %v1465_v7  ;;  %v907_v19 = vpop.f32.mrb[5].mxu0 }
 0x12d   : > { %v933_v20 = vadd.f32 %v1465_v7, %v907_v19  ;;  %v1571_v21 = vpop.f32.mrb[6].mxu0 }
 0x12e   : > { %1666 = vtanh.f32 %v935_v18  ;;  %v936_v22 = vadd.f32 %v1571_v21, %v1465_v7  ;;  %v910_v23 = vpop.f32.mrb[7].mxu0 }
 0x12f   : > { %1668 = vtanh.f32 %v933_v20  ;;  %v934_v24 = vadd.f32 %v1465_v7, %v910_v23 }
 0x130   : > { %v1659_v25 = vpop.eup %1658  ;;  %1670 = vtanh.f32 %v936_v22 }
 0x131   : > { %v1661_v26 = vpop.eup %1660  ;;  %1672 = vtanh.f32 %v934_v24 }
 0x132   : > { %v1663_v27 = vpop.eup %1662 }
 0x133   : > { %v1665_v28 = vpop.eup %1664  ;;  %v946_v29 = vpack.c.bf16 %v1663_v27, %v1659_v25 }
 0x134   : > { %v945_v30 = vpack.c.bf16 %v1665_v28, %v1661_v26 }
 0x136   : > { %1580 = vmatprep.mubr.msk.bf16.mxu1 %vm988_vm1, %v945_v30 }
 0x137   : > { %1581 = vmatmul.mubr.msk.bf16.vlgmr.msra.gmra.mrb[0].mxu1 %vm988_vm1, %v946_v29 }
 0x138   : > { %v1667_v31 = vpop.eup %1666  ;;  %1589 = vmatpush3.bf16.msra.mxu1 %v1855_v57 }
 0x139   : > { %v1669_v32 = vpop.eup %1668  ;;  %1594 = vmatprep.subr.bf16.mxu1 %v1714_v17 }
 0x13a   : > { %v1671_v33 = vpop.eup %1670 }
 0x13b   : > { %v1673_v34 = vpop.eup %1672  ;;  %v948_v35 = vpack.c.bf16 %v1671_v33, %v1667_v31 }
 0x13c   : > { %v947_v36 = vpack.c.bf16 %v1673_v34, %v1669_v32 }
 0x13e   : > { %1584 = vmatprep.mubr.msk.bf16.mxu1 %vm988_vm1, %v947_v36 }
 0x13f   : > { %1585 = vmatmul.mubr.msk.bf16.gmra.mrb[4].mxu1 %vm988_vm1, %v948_v35 }
 0x140   : > { %1590 = vmatprep.mubr.msk.bf16.mxu1 %vm1715_vm3, %v1714_v17 }
 0x20a   : > { %v1582_v38 = vpop.f32.mrb[0].mxu1 }
 0x20b   : > { %v1044_v39 = vadd.f32 %v1582_v38, %v1466_v37  ;;  %v1035_v40 = vpop.f32.mrb[1].mxu1 }
 0x20c   : > { %v1036_v41 = vadd.f32 %v1466_v37, %v1035_v40  ;;  %v1583_v42 = vpop.f32.mrb[2].mxu1 }
 0x20d   : > { %v1047_v43 = vadd.f32 %v1583_v42, %v1466_v37  ;;  %v1038_v44 = vpop.f32.mrb[3].mxu1  ;;  %v1073_v45 = vsel %vm1066_vm2, %v1044_v39, -inf }
 0x20e   : > { %v1039_v46 = vadd.f32 %v1466_v37, %v1038_v44  ;;  %1074 = vmax.xlane.f32.xlu1 %v1073_v45  ;;  %v1067_v47 = vsel %vm1066_vm2, %v1036_v41, -inf }
 0x20f   : > { %1068 = vmax.xlane.f32.xlu0 %v1067_v47  ;;  %v1076_v48 = vsel %vm1066_vm2, %v1047_v43, -inf }
 0x210   : > { %v1070_v50 = vsel %vm1066_vm2, %v1039_v46, -inf }
 0x212   : > { %1077 = vmax.xlane.f32.xlu1 %v1076_v48  ;;  %v1586_v49 = vpop.f32.mrb[4].mxu1 }
 0x213   : > { %1071 = vmax.xlane.f32.xlu0 %v1070_v50  ;;  %v1051_v51 = vpop.f32.mrb[5].mxu1  ;;  %v1060_v55 = vadd.f32 %v1586_v49, %v1466_v37 }
 0x214   : > { %v1052_v52 = vadd.f32 %v1466_v37, %v1051_v51  ;;  %v1587_v53 = vpop.f32.mrb[6].mxu1 }
 0x215   : > { %v1054_v54 = vpop.f32.mrb[7].mxu1  ;;  %v1063_v58 = vadd.f32 %v1587_v53, %v1466_v37  ;;  %v1085_v60 = vsel %vm1066_vm2, %v1060_v55, -inf }
 0x216   : > { %v1055_v56 = vadd.f32 %v1466_v37, %v1054_v54  ;;  %v1079_v57 = vsel %vm1066_vm2, %v1052_v52, -inf }
 0x217   : > { %1080 = vmax.xlane.f32.xlu0 %v1079_v57  ;;  %v1088_v61 = vsel %vm1066_vm2, %v1063_v58, -inf }
 0x218   : > { %v1082_v59 = vsel %vm1066_vm2, %v1055_v56, -inf }
 0x219   : > { %1083 = vmax.xlane.f32.xlu1 %v1082_v59 }
 0x21b   : > { %1086 = vmax.xlane.f32.xlu0 %v1085_v60 }
 0x21d   : > { %1089 = vmax.xlane.f32.xlu1 %v1088_v61 }
 0x29b   : > { %v1075_v62 = vpop.xlane.xlu1 %1074 }
 0x29c   : > { %v1093_v3 = vsub.f32 %v1044_v39, %v1075_v62  ;;  %v1069_v4 = vpop.xlane.xlu0 %1068 }
 0x29d   : > { %v1091_v5 = vsub.f32 %v1036_v41, %v1069_v4 }
 0x29e   : > { %v1103_v6 = vmul.f32 1.442695, %v1093_v3 }
 0x29f   : > { %v1099_v7 = vmul.f32 1.442695, %v1091_v5  ;;  %v1078_v8 = vpop.xlane.xlu1 %1077 }
 0x2a0   : > { %v1094_v9 = vsub.f32 %v1047_v43, %v1078_v8  ;;  %v1072_v10 = vpop.xlane.xlu0 %1071 }
 0x2a1   : > { %1674 = vpow2.f32 %v1099_v7  ;;  %v1092_v11 = vsub.f32 %v1039_v46, %v1072_v10 }
 0x2a2   : > { %1676 = vpow2.f32 %v1103_v6  ;;  %v1105_v12 = vmul.f32 1.442695, %v1094_v9 }
 0x2a3   : > { %v1101_v13 = vmul.f32 1.442695, %v1092_v11 }
 0x2a4   : > { %v1081_v14 = vpop.xlane.xlu0 %1080 }
 0x2a5   : > { %1678 = vpow2.f32 %v1101_v13  ;;  %v1095_v15 = vsub.f32 %v1052_v52, %v1081_v14 }
 0x2a6   : > { %v1084_v16 = vpop.xlane.xlu1 %1083  ;;  %1680 = vpow2.f32 %v1105_v12 }
 0x2a7   : > { %v1107_v18 = vmul.f32 1.442695, %v1095_v15  ;;  %v1096_v19 = vsub.f32 %v1055_v56, %v1084_v16 }
 0x2a8   : > { %v1087_v20 = vpop.xlane.xlu0 %1086 }
 0x2a9   : > { %1682 = vpow2.f32 %v1107_v18  ;;  %v1109_v21 = vmul.f32 1.442695, %v1096_v19  ;;  %v1097_v22 = vsub.f32 %v1060_v55, %v1087_v20 }
 0x2aa   : > { %v1090_v23 = vpop.xlane.xlu1 %1089 }
 0x2ab   : > { %v1675_v24 = vpop.eup %1674  ;;  %1684 = vpow2.f32 %v1109_v21  ;;  %v1111_v25 = vmul.f32 1.442695, %v1097_v22  ;;  %v1098_v26 = vsub.f32 %v1063_v58, %v1090_v23 }
 0x2ac   : > { %v1115_v27 = vsel %vm1066_vm2, %v1675_v24, 0.0  ;;  %v1677_v28 = vpop.eup %1676 }
 0x2ad   : > { %1686 = vpow2.f32 %v1111_v25  ;;  %v1113_v29 = vmul.f32 1.442695, %v1098_v26  ;;  %1116 = vadd.xlane.f32.xlu0 %v1115_v27  ;;  %v1121_v32 = vsel %vm1066_vm2, %v1677_v28, 0.0 }
 0x2af   : > { %v1679_v30 = vpop.eup %1678  ;;  %1688 = vpow2.f32 %v1113_v29 }
 0x2b0   : > { %v1118_v31 = vsel %vm1066_vm2, %v1679_v30, 0.0  ;;  %v1681_v33 = vpop.eup %1680 }
 0x2b1   : > { %1119 = vadd.xlane.f32.xlu1 %v1118_v31  ;;  %1122 = vadd.xlane.f32.xlu0 %v1121_v32  ;;  %v1124_v35 = vsel %vm1066_vm2, %v1681_v33, 0.0 }
 0x2b3   : > { %v1683_v34 = vpop.eup %1682 }
 0x2b4   : > { %v1127_v36 = vsel %vm1066_vm2, %v1683_v34, 0.0 }
 0x2b5   : > { %v1685_v37 = vpop.eup %1684  ;;  %1125 = vadd.xlane.f32.xlu1 %v1124_v35  ;;  %1128 = vadd.xlane.f32.xlu0 %v1127_v36 }
 0x2b6   : > { %v1130_v39 = vsel %vm1066_vm2, %v1685_v37, 0.0 }
 0x2b7   : > { %v1687_v38 = vpop.eup %1686 }
 0x2b8   : > { %v1133_v40 = vsel %vm1066_vm2, %v1687_v38, 0.0 }
 0x2b9   : > { %v1689_v41 = vpop.eup %1688  ;;  %1131 = vadd.xlane.f32.xlu1 %v1130_v39  ;;  %1134 = vadd.xlane.f32.xlu0 %v1133_v40 }
 0x2ba   : > { %v1136_v42 = vsel %vm1066_vm2, %v1689_v41, 0.0 }
 0x2bd   : > { %1137 = vadd.xlane.f32.xlu1 %v1136_v42 }
 0x33a   : > { %v1117_v43 = vpop.xlane.xlu0 %1116 }
 0x33b   : > { %1690 = vrcp.f32 %v1117_v43 }
 0x33e   : > { %v1120_v44 = vpop.xlane.xlu1 %1119  ;;  %v1123_v45 = vpop.xlane.xlu0 %1122 }
 0x33f   : > { %1692 = vrcp.f32 %v1120_v44 }
 0x342   : > { %v1126_v46 = vpop.xlane.xlu1 %1125  ;;  %v1129_v52 = vpop.xlane.xlu0 %1128 }
 0x343   : > { %1694 = vrcp.f32 %v1126_v46 }
 0x344   : > { %1696 = vrcp.f32 %v1123_v45 }
 0x345   : > { %v1691_v47 = vpop.eup %1690 }
 0x346   : > { %v1132_v48 = vpop.xlane.xlu1 %1131  ;;  %v1147_v50 = vmul.f32 %v1691_v47, %v1675_v24  ;;  %v1135_v59 = vpop.xlane.xlu0 %1134 }
 0x347   : > { %1698 = vrcp.f32 %v1132_v48 }
 0x348   : > { %1700 = vrcp.f32 %v1129_v52 }
 0x349   : > { %v1693_v49 = vpop.eup %1692 }
 0x34a   : > { %v1148_v51 = vmul.f32 %v1693_v49, %v1679_v30  ;;  %v1138_v57 = vpop.xlane.xlu1 %1137 }
 0x34b   : > { %1702 = vrcp.f32 %v1138_v57 }
 0x34c   : > { %v1155_v53 = vpack.c.bf16 %v1148_v51, %v1147_v50  ;;  %1704 = vrcp.f32 %v1135_v59 }
 0x34d   : > { %v1695_v54 = vpop.eup %1694 }
 0x34e   : > { %1591 = vmatmul.mubr.msk.bf16.vlgmr.msra.gmra.mrb[8].mxu1 %vm1066_vm2, %v1155_v53  ;;  %v1697_v55 = vpop.eup %1696  ;;  %v1150_v56 = vmul.f32 %v1695_v54, %v1681_v33 }
 0x34f   : > { %1595 = vmatpush3.bf16.msra.mxu1 %v1873_v63  ;;  %1596 = vmatprep.mubr.msk.bf16.mxu1 %vm1715_vm3, %v1714_v17  ;;  %v1149_v58 = vmul.f32 %v1697_v55, %v1677_v28 }
 0x350   : > { %1600 = vmatprep.subr.bf16.mxu1 %v1714_v17 }
 0x351   : > { %v1156_v60 = vpack.c.bf16 %v1150_v56, %v1149_v58  ;;  %v1699_v61 = vpop.eup %1698 }
 0x352   : > { %v1701_v62 = vpop.eup %1700  ;;  %v1152_v63 = vmul.f32 %v1699_v61, %v1685_v37 }
 0x353   : > { %v1151_v3 = vmul.f32 %v1701_v62, %v1683_v34 }
 0x355   : > { %v1157_v4 = vpack.c.bf16 %v1152_v63, %v1151_v3  ;;  %v1703_v5 = vpop.eup %1702 }
 0x356   : > { %1597 = vmatmul.mubr.msk.bf16.vlgmr.msra.gmra.mrb[12].mxu1 %vm1066_vm2, %v1156_v60  ;;  %v1705_v6 = vpop.eup %1704  ;;  %v1154_v7 = vmul.f32 %v1703_v5, %v1689_v41 }
 0x357   : > { %1601 = vmatpush3.bf16.msra.mxu1 %v1875_v0  ;;  %1602 = vmatprep.mubr.msk.bf16.mxu1 %vm1715_vm3, %v1714_v17  ;;  %v1153_v8 = vmul.f32 %v1705_v6, %v1687_v38 }
 0x358   : > { %1606 = vmatprep.subr.bf16.mxu1 %v1714_v17 }
 0x359   : > { %v1158_v0 = vpack.c.bf16 %v1154_v7, %v1153_v8 }
 0x35e   : > { %1603 = vmatmul.mubr.msk.bf16.vlgmr.msra.gmra.mrb[16].mxu1 %vm1066_vm2, %v1157_v4 }
 0x35f   : > { %1607 = vmatpush3.bf16.msra.mxu1 %v1879_v2  ;;  %1608 = vmatprep.mubr.msk.bf16.mxu1 %vm1715_vm3, %v1714_v17 }
 0x366   : > { %1609 = vmatmul.mubr.msk.bf16.vlgmr.msra.gmra.mrb[20].mxu1 %vm1066_vm2, %v1158_v0 }
 0x421   : > { %v1196_v9 = vpop.f32.mrb[8].mxu1 }
 0x422   : > { %1335 = vst [vmem:[%s321_s21] sm:$0xff] %v1196_v9  ;;  %v1592_v10 = vpop.f32.mrb[9].mxu1 }
 0x423   : > { %v1199_v11 = vpop.f32.mrb[10].mxu1 }
 0x424   : > { %1336 = vst [vmem:[%s321_s21 + $0x8] sm:$0xff] %v1199_v11  ;;  %v1593_v12 = vpop.f32.mrb[11].mxu1 }
 0x429   : > { %v1240_v2 = vpop.f32.mrb[12].mxu1 }
 0x42a   : > { %1337 = vst [vmem:[%s321_s21 + $0x10] sm:$0xff] %v1240_v2  ;;  %v1598_v13 = vpop.f32.mrb[13].mxu1 }
 0x42b   : > { %v1243_v17 = vpop.f32.mrb[14].mxu1 }
 0x42c   : > { %1338 = vst [vmem:[%s321_s21 + $0x18] sm:$0xff] %v1243_v17  ;;  %v1599_v14 = vpop.f32.mrb[15].mxu1 }
 0x431   : > { %v1284_v15 = vpop.f32.mrb[16].mxu1 }
 0x432   : > { %1339 = vst [vmem:[%s321_s21 + $0x20] sm:$0xff] %v1284_v15  ;;  %v1604_v16 = vpop.f32.mrb[17].mxu1 }
 0x433   : > { %v1287_v18 = vpop.f32.mrb[18].mxu1 }
 0x434   : > { %1340 = vst [vmem:[%s321_s21 + $0x28] sm:$0xff] %v1287_v18  ;;  %v1605_v19 = vpop.f32.mrb[19].mxu1 }
 0x439   : > { %v1328_v20 = vpop.f32.mrb[20].mxu1 }
 0x43a   : > { %1341 = vst [vmem:[%s321_s21 + $0x30] sm:$0xff] %v1328_v20  ;;  %v1610_v21 = vpop.f32.mrb[21].mxu1 }
 0x43b   : > { %v1331_v22 = vpop.f32.mrb[22].mxu1 }
 0x43c   : > { %1342 = vst [vmem:[%s321_s21 + $0x38] sm:$0xff] %v1331_v22  ;;  %v1611_v23 = vpop.f32.mrb[23].mxu1 }
 0x43d PF: > { %s28_s29 = sadd.s32 1, %s1712_s29  }
 0x43e   : > { %p25_p4 = scmp.ge.s32.totalorder %s28_s29, 4  }
 0x440   :  { %27 = sbr.rel (!%p25_p4) target bundleno = 3 (0x3), region = 109 }

</bundles_post_ra>
